<compile_context>
chip_gen: v7x
topology: tpu7x:2x2x1
jax: 0.10.0
libtpu: 0.0.40
codegen_flags: <defaults>
</compile_context>

<pallas_src>
import functools

import numpy as np
import jax
import jax.numpy as jnp
from jax.experimental import pallas as pl
from jax.experimental.pallas import tpu as pltpu


def _round_up(v, m):
    return ((v + m - 1) // m) * m


# ----------------------------------------------------------------------------
# In-kernel math helpers (only ops with guaranteed Mosaic lowerings).
# ----------------------------------------------------------------------------
def _gelu_exact(x):
    # torch.nn.GELU() (approximate='none'): 0.5*x*(1 + erf(x/sqrt(2))).
    # erf via Abramowitz & Stegun 7.1.26 (|err| < 1.5e-7).  The divide is
    # replaced by an EUP approx reciprocal, which sits in the otherwise-idle
    # EUP slot next to the exp/cos/sin pushes instead of burning VALU slots.
    # TODO(synk): tanh-approx GELU would drop ~8 VALU ops/element if callers
    # accept approximate-GELU semantics (torch exact-GELU kept here).
    a1, a2, a3, a4, a5 = 0.254829592, -0.284496736, 1.421413741, -1.453152027, 1.061405429
    p = 0.3275911
    z = jnp.abs(x) * np.float32(1.0 / np.sqrt(2.0))
    t = pl.reciprocal(1.0 + p * z, approx=True)
    poly = t * (a1 + t * (a2 + t * (a3 + t * (a4 + t * a5))))
    q = poly * jnp.exp(-z * z)
    return 0.5 * x * jnp.where(x >= 0.0, 2.0 - q, q)


# ----------------------------------------------------------------------------
# Kernel: one duplex row-tile goes through the full forward pass.
# Duplex physical row r holds logical rows 2r and 2r+1 side by side.
# ----------------------------------------------------------------------------
def lfpe_kernel(F_dim,
                x_ref,                      # (T, 2M)   f32  [x_{2r} | x_{2r+1}]
                win_ref,                    # (2M, 3F)  bf16 fused stage-1 weight
                bh_ref,                     # (1, 2F)   f32  [b1 | b1]
                w2_ref, b2_ref,             # (2F, F) bf16, (1, F) f32
                w3c_ref, w3s_ref, b3_ref,   # (F, 2H) bf16 x2, (1, 2H) f32
                w4_ref, b4_ref,             # (2H, 2F) bf16, (1, 2F) f32
                out_ref):                   # (T, 2F)   bf16 [out_{2r} | out_{2r+1}]
    F2 = 2 * F_dim
    # bf16 MXU operands everywhere, f32 accumulation (preferred_element_type).
    x = x_ref[...].astype(jnp.bfloat16)

    # Fused stage 1: one matmul produces
    #   y = [h_{2r}(F) | h_{2r+1}(F) | proj_{2r}(F/2) | proj_{2r+1}(F/2)]
    y = jnp.dot(x, win_ref[...], preferred_element_type=jnp.float32)

    # scale = Ws(x_s) = Linear -> GELU -> Linear (duplex)
    h = _gelu_exact(y[:, :F2] + bh_ref[...])
    scale = jnp.dot(h.astype(jnp.bfloat16), w2_ref[...],
                    preferred_element_type=jnp.float32) + b2_ref[...]

    # modulate projected features (duplex, elementwise, f32)
    # NOTE: with 2*F_dim a multiple of 128 this slice stays lane-tile aligned.
    p = y[:, F2:] * scale

    # Fourier features without concatenate: 1/sqrt(F) folded into w3c/w3s.
    m = (jnp.dot(jnp.cos(p).astype(jnp.bfloat16), w3c_ref[...],
                 preferred_element_type=jnp.float32)
         + jnp.dot(jnp.sin(p).astype(jnp.bfloat16), w3s_ref[...],
                   preferred_element_type=jnp.float32)
         + b3_ref[...])
    m = _gelu_exact(m)

    # PEx = mlp(F): second linear, lane-dense (T, 2F) bf16 output store.
    out = jnp.dot(m.astype(jnp.bfloat16), w4_ref[...],
                  preferred_element_type=jnp.float32) + b4_ref[...]
    out_ref[...] = out.astype(out_ref.dtype)


# ----------------------------------------------------------------------------
# Wrapper-side weight preparation (duplex / fused layout)
# ----------------------------------------------------------------------------
def _block_diag2(a):
    k, n = a.shape
    z = jnp.zeros((k, n), a.dtype)
    return jnp.concatenate(
        [jnp.concatenate([a, z], axis=1),
         jnp.concatenate([z, a], axis=1)], axis=0)


def _duplex_params(params, *, M, F_dim):
    halfM, halfF = M // 2, F_dim // 2
    f32, bf16 = jnp.float32, jnp.bfloat16
    wr = params["wr"].astype(f32)
    w1, b1 = params["w1"].astype(f32), params["b1"].astype(f32)
    w2, b2 = params["w2"].astype(f32), params["b2"].astype(f32)
    w3, b3 = params["w3"].astype(f32), params["b3"].astype(f32)
    w4, b4 = params["w4"].astype(f32), params["b4"].astype(f32)

    # Fused stage-1 weight: maps [x_{2r}(M) | x_{2r+1}(M)]  ->
    #   [h_{2r}(F) | h_{2r+1}(F) | proj_{2r}(F/2) | proj_{2r+1}(F/2)]
    w_in = jnp.zeros((2 * M, 3 * F_dim), f32)
    w_in = w_in.at[halfM:M,          0:F_dim].set(w1)
    w_in = w_in.at[M + halfM:2 * M,  F_dim:2 * F_dim].set(w1)
    w_in = w_in.at[0:halfM,          2 * F_dim:2 * F_dim + halfF].set(wr)
    w_in = w_in.at[M:M + halfM,      2 * F_dim + halfF:3 * F_dim].set(wr)

    b_h = jnp.concatenate([b1, b1], axis=1)            # (1, 2F)  f32
    w2_2 = _block_diag2(w2)                            # (2F, F)
    b2_2 = jnp.concatenate([b2, b2], axis=1)           # (1, F)   f32

    c = np.float32(1.0 / np.sqrt(F_dim))               # folded Fourier scale
    w3c_2 = _block_diag2(c * w3[:halfF])               # (F, 2H)  cos half
    w3s_2 = _block_diag2(c * w3[halfF:])               # (F, 2H)  sin half
    b3_2 = jnp.concatenate([b3, b3], axis=1)           # (1, 2H)  f32

    w4_2 = _block_diag2(w4)                            # (2H, 2F)
    b4_2 = jnp.concatenate([b4, b4], axis=1)           # (1, 2F)  f32

    # Matmul weights in bf16 (MXU-native), biases stay f32.
    return (w_in.astype(bf16), b_h,
            w2_2.astype(bf16), b2_2,
            w3c_2.astype(bf16), w3s_2.astype(bf16), b3_2,
            w4_2.astype(bf16), b4_2)


def _pick_tile(R2, row_tile):
    """Duplex-row tile.  Multiples of 16 keep the f32 input block (8 sublanes)
    and the bf16 output block (16 sublanes) tile-aligned; a full-extent block
    is always legal."""
    if R2 % 8 == 0 and R2 <= row_tile:
        tile = R2
    else:
        tile = max(16, (min(row_tile, _round_up(R2, 16)) // 16) * 16)
    # v7x megacore: "parallel" shards the 1-D grid across 2 TensorCores; make
    # sure there are >= 2 tiles whenever there is enough work to split.
    if pl.cdiv(R2, tile) < 2 and R2 >= 32:
        tile = max(16, _round_up(pl.cdiv(R2, 2), 16))
    return tile


# ----------------------------------------------------------------------------
# Wrapper
# ----------------------------------------------------------------------------
def learnable_fourier_pe(x, params, *, M, F_dim, H_dim, row_tile=1024,
                         out_dtype=jnp.bfloat16):
    """row_tile = duplex rows per grid step (= 2x logical rows).

    1024 duplex rows amortizes the ~600-cycle per-grid-step overhead; per-tile
    VMEM (f32 x 1024x32 + bf16 out 1024x128 + intermediates, double-buffered)
    plus ~100 KiB of resident bf16 weights stays a few MiB -- far under the
    32 MiB scoped-VMEM default on every generation (and v7x's 64 MiB physical).
    """
    B, N, D = x.shape
    assert D == M and M % 2 == 0 and F_dim % 2 == 0
    R = B * N

    x2 = x.reshape(R, M)                       # bitcast reshape
    if R % 2:
        # TODO(synk): odd logical row counts need one pad row to form duplex
        # pairs (single full copy).  Even R (the common case) never pads:
        # ragged last row-tiles are handled by Pallas partial blocks.
        x2 = jnp.pad(x2, ((0, 1), (0, 0)))
    R2 = x2.shape[0] // 2
    x2 = x2.reshape(R2, 2 * M)                 # duplex slab (bitcast reshape)

    wts = _duplex_params(params, M=M, F_dim=F_dim)
    tile = _pick_tile(R2, row_tile)
    grid = (pl.cdiv(R2, tile),)
    full = lambda i: (0, 0)                    # weights: resident single block

    out2 = pl.pallas_call(
        functools.partial(lfpe_kernel, F_dim),
        out_shape=jax.ShapeDtypeStruct((R2, 2 * F_dim), out_dtype),
        grid=grid,
        in_specs=[
            pl.BlockSpec((tile, 2 * M), lambda i: (i, 0)),      # x (duplex rows)
            pl.BlockSpec((2 * M, 3 * F_dim), full),             # fused stage-1 W
            pl.BlockSpec((1, 2 * F_dim), full),                 # [b1 | b1]
            pl.BlockSpec((2 * F_dim, F_dim), full),             # blockdiag(w2)
            pl.BlockSpec((1, F_dim), full),                     # [b2 | b2]
            pl.BlockSpec((F_dim, 2 * H_dim), full),             # blockdiag(w3 cos)
            pl.BlockSpec((F_dim, 2 * H_dim), full),             # blockdiag(w3 sin)
            pl.BlockSpec((1, 2 * H_dim), full),                 # [b3 | b3]
            pl.BlockSpec((2 * H_dim, 2 * F_dim), full),         # blockdiag(w4)
            pl.BlockSpec((1, 2 * F_dim), full),                 # [b4 | b4]
        ],
        out_specs=pl.BlockSpec((tile, 2 * F_dim), lambda i: (i, 0)),  # 128-lane dense
        compiler_params=pltpu.CompilerParams(
            dimension_semantics=("parallel",)),
    )(x2, *wts)

    # Keep bf16 (caller can cast); slicing only matters in the odd-R case.
    return out2.reshape(2 * R2, F_dim)[:R].reshape(B, N, F_dim)


# ----------------------------------------------------------------------------
# Pure-JAX reference (sanity check against the original module semantics)
# ----------------------------------------------------------------------------
def reference(x, params, *, M, F_dim):
    half = M // 2
    proj = x[..., :half] @ params["wr"]
    h = jax.nn.gelu(x[..., half:] @ params["w1"] + params["b1"][0], approximate=False)
    scale = h @ params["w2"] + params["b2"][0]
    p = proj * scale
    f = (1.0 / np.sqrt(F_dim)) * jnp.concatenate([jnp.cos(p), jnp.sin(p)], axis=-1)
    m = jax.nn.gelu(f @ params["w3"] + params["b3"][0], approximate=False)
    return m @ params["w4"] + params["b4"][0]


# ----------------------------------------------------------------------------
# Deterministic parameter construction (shapes match the nn.Module __init__,
# stored as (in_features, out_features))
# ----------------------------------------------------------------------------
def make_params(key, *, M, F_dim, H_dim, gamma):
    ks = jax.random.split(key, 9)
    std_wr = gamma ** (-2.0)          # nn.init.normal_(Wr.weight, std=gamma**-2)

    def lin(k, fan_in, fan_out, scale):
        return scale * jax.random.normal(k, (fan_in, fan_out), jnp.float32)

    return {
        "wr": std_wr * jax.random.normal(ks[0], (M // 2, F_dim // 2), jnp.float32),
        "w1": lin(ks[1], M // 2, F_dim, 1.0 / np.sqrt(M // 2)),
        "b1": 0.01 * jax.random.normal(ks[2], (1, F_dim), jnp.float32),
        "w2": lin(ks[3], F_dim, F_dim // 2, 1.0 / np.sqrt(F_dim)),
        "b2": 0.01 * jax.random.normal(ks[4], (1, F_dim // 2), jnp.float32),
        "w3": lin(ks[5], F_dim, H_dim, 1.0 / np.sqrt(F_dim)),
        "b3": 0.01 * jax.random.normal(ks[6], (1, H_dim), jnp.float32),
        "w4": lin(ks[7], H_dim, F_dim, 1.0 / np.sqrt(H_dim)),
        "b4": 0.01 * jax.random.normal(ks[8], (1, F_dim), jnp.float32),
    }


if __name__ == "__main__":
    # Small shapes consistent with forward(): x is (B, N, D) with D == M.
    B, N = 2, 8
    M, F_dim, H_dim, gamma = 16, 64, 32, 1.0

    key = jax.random.PRNGKey(0)
    kx, kp = jax.random.split(key)
    x = jax.random.normal(kx, (B, N, M), jnp.float32)
    params = make_params(kp, M=M, F_dim=F_dim, H_dim=H_dim, gamma=gamma)

    out = learnable_fourier_pe(x, params, M=M, F_dim=F_dim, H_dim=H_dim)
    out = jax.block_until_ready(out)

    ref = reference(x, params, M=M, F_dim=F_dim)
    # Tolerance reflects the bf16 MXU operands + bf16 output store (f32 accum);
    # the pure-f32 path validated previously at 1e-3.
    np.testing.assert_allclose(np.asarray(out, dtype=np.float32), np.asarray(ref),
                               rtol=5e-2, atol=4e-2)

    assert out.shape == (B, N, F_dim)
    print("KERNEL_OK")
</pallas_src>

<mosaic_0001>
module attributes {stable_mosaic.version = 11 : i64} {
  func.func @lfpe_kernel(%arg0: i32, %arg1: memref<8x32xf32, #tpu.memory_space<vmem>>, %arg2: memref<32x192xbf16, #tpu.memory_space<vmem>>, %arg3: memref<1x128xf32, #tpu.memory_space<vmem>>, %arg4: memref<128x64xbf16, #tpu.memory_space<vmem>>, %arg5: memref<1x64xf32, #tpu.memory_space<vmem>>, %arg6: memref<64x64xbf16, #tpu.memory_space<vmem>>, %arg7: memref<64x64xbf16, #tpu.memory_space<vmem>>, %arg8: memref<1x64xf32, #tpu.memory_space<vmem>>, %arg9: memref<64x128xbf16, #tpu.memory_space<vmem>>, %arg10: memref<1x128xf32, #tpu.memory_space<vmem>>, %arg11: memref<8x128xbf16, #tpu.memory_space<vmem>>) attributes {dimension_semantics = [#tpu.dimension_semantics<parallel>], iteration_bounds = array<i64: 1>, scalar_prefetch = 0 : i64, scratch_operands = 0 : i64, tpu.core_type = #tpu.core_type<tc>, window_params = [{transform_indices = @transform_0, window_bounds = array<i64: 8, 32>}, {pipeline_mode = #tpu.pipeline_mode<synchronous>, transform_indices = @transform_1, window_bounds = array<i64: 32, 192>}, {pipeline_mode = #tpu.pipeline_mode<synchronous>, transform_indices = @transform_2, window_bounds = array<i64: 1, 128>}, {pipeline_mode = #tpu.pipeline_mode<synchronous>, transform_indices = @transform_3, window_bounds = array<i64: 128, 64>}, {pipeline_mode = #tpu.pipeline_mode<synchronous>, transform_indices = @transform_4, window_bounds = array<i64: 1, 64>}, {pipeline_mode = #tpu.pipeline_mode<synchronous>, transform_indices = @transform_5, window_bounds = array<i64: 64, 64>}, {pipeline_mode = #tpu.pipeline_mode<synchronous>, transform_indices = @transform_6, window_bounds = array<i64: 64, 64>}, {pipeline_mode = #tpu.pipeline_mode<synchronous>, transform_indices = @transform_7, window_bounds = array<i64: 1, 64>}, {pipeline_mode = #tpu.pipeline_mode<synchronous>, transform_indices = @transform_8, window_bounds = array<i64: 64, 128>}, {pipeline_mode = #tpu.pipeline_mode<synchronous>, transform_indices = @transform_9, window_bounds = array<i64: 1, 128>}, {transform_indices = @transform_10, window_bounds = array<i64: 8, 128>}]} {
    %c0 = arith.constant 0 : index
    %c0_0 = arith.constant 0 : index
    %0 = vector.load %arg1[%c0, %c0_0] : memref<8x32xf32, #tpu.memory_space<vmem>>, vector<8x32xf32>
    %1 = arith.truncf %0 : vector<8x32xf32> to vector<8x32xbf16>
    %c0_1 = arith.constant 0 : index
    %c0_2 = arith.constant 0 : index
    %2 = vector.load %arg2[%c0_1, %c0_2] : memref<32x192xbf16, #tpu.memory_space<vmem>>, vector<32x192xbf16>
    %cst = arith.constant dense<0.000000e+00> : vector<8x192xf32>
    %3 = tpu.matmul %1, %2, %cst {dimension_numbers = #tpu.dot_dimension_numbers<[1], [0], [0], [1], [0, 0, 1, 1], [], []>} : vector<8x32xbf16>, vector<32x192xbf16>, vector<8x192xf32> -> vector<8x192xf32>
    %4 = vector.extract_strided_slice %3 {offsets = [0, 0], sizes = [8, 128], strides = [1, 1]} : vector<8x192xf32> to vector<8x128xf32>
    %c0_3 = arith.constant 0 : index
    %c0_4 = arith.constant 0 : index
    %5 = vector.load %arg3[%c0_3, %c0_4] : memref<1x128xf32, #tpu.memory_space<vmem>>, vector<1x128xf32>
    %6 = vector.broadcast %5 : vector<1x128xf32> to vector<8x128xf32>
    %7 = arith.addf %4, %6 : vector<8x128xf32>
    %8 = math.absf %7 : vector<8x128xf32>
    %cst_5 = arith.constant 0.707106769 : f32
    %9 = vector.broadcast %cst_5 : f32 to vector<8x128xf32>
    %10 = arith.mulf %8, %9 : vector<8x128xf32>
    %cst_6 = arith.constant 0.327591091 : f32
    %11 = vector.broadcast %cst_6 : f32 to vector<8x128xf32>
    %12 = arith.mulf %11, %10 : vector<8x128xf32>
    %cst_7 = arith.constant 1.000000e+00 : f32
    %13 = vector.broadcast %cst_7 : f32 to vector<8x128xf32>
    %14 = arith.addf %13, %12 : vector<8x128xf32>
    %15 = tpu.reciprocal %14 {approx = true} : vector<8x128xf32> -> vector<8x128xf32>
    %cst_8 = arith.constant 1.06140542 : f32
    %16 = vector.broadcast %cst_8 : f32 to vector<8x128xf32>
    %17 = arith.mulf %15, %16 : vector<8x128xf32>
    %cst_9 = arith.constant -1.45315206 : f32
    %18 = vector.broadcast %cst_9 : f32 to vector<8x128xf32>
    %19 = arith.addf %18, %17 : vector<8x128xf32>
    %20 = arith.mulf %15, %19 : vector<8x128xf32>
    %cst_10 = arith.constant 1.42141378 : f32
    %21 = vector.broadcast %cst_10 : f32 to vector<8x128xf32>
    %22 = arith.addf %21, %20 : vector<8x128xf32>
    %23 = arith.mulf %15, %22 : vector<8x128xf32>
    %cst_11 = arith.constant -0.284496725 : f32
    %24 = vector.broadcast %cst_11 : f32 to vector<8x128xf32>
    %25 = arith.addf %24, %23 : vector<8x128xf32>
    %26 = arith.mulf %15, %25 : vector<8x128xf32>
    %cst_12 = arith.constant 0.254829586 : f32
    %27 = vector.broadcast %cst_12 : f32 to vector<8x128xf32>
    %28 = arith.addf %27, %26 : vector<8x128xf32>
    %29 = arith.mulf %15, %28 : vector<8x128xf32>
    %cst_13 = arith.constant 0.000000e+00 : f32
    %30 = vector.broadcast %cst_13 : f32 to vector<8x128xf32>
    %31 = arith.subf %30, %10 : vector<8x128xf32>
    %32 = arith.mulf %31, %10 : vector<8x128xf32>
    %33 = math.exp %32 : vector<8x128xf32>
    %34 = arith.mulf %29, %33 : vector<8x128xf32>
    %cst_14 = arith.constant 5.000000e-01 : f32
    %35 = vector.broadcast %cst_14 : f32 to vector<8x128xf32>
    %36 = arith.mulf %35, %7 : vector<8x128xf32>
    %cst_15 = arith.constant 0.000000e+00 : f32
    %37 = vector.broadcast %cst_15 : f32 to vector<8x128xf32>
    %38 = arith.cmpf oge, %7, %37 : vector<8x128xf32>
    %cst_16 = arith.constant 2.000000e+00 : f32
    %39 = vector.broadcast %cst_16 : f32 to vector<8x128xf32>
    %40 = arith.subf %39, %34 : vector<8x128xf32>
    %41 = arith.select %38, %40, %34 : vector<8x128xi1>, vector<8x128xf32>
    %42 = arith.mulf %36, %41 : vector<8x128xf32>
    %43 = arith.truncf %42 : vector<8x128xf32> to vector<8x128xbf16>
    %c0_17 = arith.constant 0 : index
    %c0_18 = arith.constant 0 : index
    %44 = vector.load %arg4[%c0_17, %c0_18] : memref<128x64xbf16, #tpu.memory_space<vmem>>, vector<128x64xbf16>
    %cst_19 = arith.constant dense<0.000000e+00> : vector<8x64xf32>
    %45 = tpu.matmul %43, %44, %cst_19 {dimension_numbers = #tpu.dot_dimension_numbers<[1], [0], [0], [1], [0, 0, 1, 1], [], []>} : vector<8x128xbf16>, vector<128x64xbf16>, vector<8x64xf32> -> vector<8x64xf32>
    %c0_20 = arith.constant 0 : index
    %c0_21 = arith.constant 0 : index
    %46 = vector.load %arg5[%c0_20, %c0_21] : memref<1x64xf32, #tpu.memory_space<vmem>>, vector<1x64xf32>
    %47 = vector.broadcast %46 : vector<1x64xf32> to vector<8x64xf32>
    %48 = arith.addf %45, %47 : vector<8x64xf32>
    %49 = vector.extract_strided_slice %3 {offsets = [0, 128], sizes = [8, 64], strides = [1, 1]} : vector<8x192xf32> to vector<8x64xf32>
    %50 = arith.mulf %49, %48 : vector<8x64xf32>
    %51 = math.cos %50 : vector<8x64xf32>
    %52 = arith.truncf %51 : vector<8x64xf32> to vector<8x64xbf16>
    %c0_22 = arith.constant 0 : index
    %c0_23 = arith.constant 0 : index
    %53 = vector.load %arg6[%c0_22, %c0_23] : memref<64x64xbf16, #tpu.memory_space<vmem>>, vector<64x64xbf16>
    %cst_24 = arith.constant dense<0.000000e+00> : vector<8x64xf32>
    %54 = tpu.matmul %52, %53, %cst_24 {dimension_numbers = #tpu.dot_dimension_numbers<[1], [0], [0], [1], [0, 0, 1, 1], [], []>} : vector<8x64xbf16>, vector<64x64xbf16>, vector<8x64xf32> -> vector<8x64xf32>
    %55 = math.sin %50 : vector<8x64xf32>
    %56 = arith.truncf %55 : vector<8x64xf32> to vector<8x64xbf16>
    %c0_25 = arith.constant 0 : index
    %c0_26 = arith.constant 0 : index
    %57 = vector.load %arg7[%c0_25, %c0_26] : memref<64x64xbf16, #tpu.memory_space<vmem>>, vector<64x64xbf16>
    %cst_27 = arith.constant dense<0.000000e+00> : vector<8x64xf32>
    %58 = tpu.matmul %56, %57, %cst_27 {dimension_numbers = #tpu.dot_dimension_numbers<[1], [0], [0], [1], [0, 0, 1, 1], [], []>} : vector<8x64xbf16>, vector<64x64xbf16>, vector<8x64xf32> -> vector<8x64xf32>
    %59 = arith.addf %54, %58 : vector<8x64xf32>
    %c0_28 = arith.constant 0 : index
    %c0_29 = arith.constant 0 : index
    %60 = vector.load %arg8[%c0_28, %c0_29] : memref<1x64xf32, #tpu.memory_space<vmem>>, vector<1x64xf32>
    %61 = vector.broadcast %60 : vector<1x64xf32> to vector<8x64xf32>
    %62 = arith.addf %59, %61 : vector<8x64xf32>
    %63 = math.absf %62 : vector<8x64xf32>
    %cst_30 = arith.constant 0.707106769 : f32
    %64 = vector.broadcast %cst_30 : f32 to vector<8x64xf32>
    %65 = arith.mulf %63, %64 : vector<8x64xf32>
    %cst_31 = arith.constant 0.327591091 : f32
    %66 = vector.broadcast %cst_31 : f32 to vector<8x64xf32>
    %67 = arith.mulf %66, %65 : vector<8x64xf32>
    %cst_32 = arith.constant 1.000000e+00 : f32
    %68 = vector.broadcast %cst_32 : f32 to vector<8x64xf32>
    %69 = arith.addf %68, %67 : vector<8x64xf32>
    %70 = tpu.reciprocal %69 {approx = true} : vector<8x64xf32> -> vector<8x64xf32>
    %cst_33 = arith.constant 1.06140542 : f32
    %71 = vector.broadcast %cst_33 : f32 to vector<8x64xf32>
    %72 = arith.mulf %70, %71 : vector<8x64xf32>
    %cst_34 = arith.constant -1.45315206 : f32
    %73 = vector.broadcast %cst_34 : f32 to vector<8x64xf32>
    %74 = arith.addf %73, %72 : vector<8x64xf32>
    %75 = arith.mulf %70, %74 : vector<8x64xf32>
    %cst_35 = arith.constant 1.42141378 : f32
    %76 = vector.broadcast %cst_35 : f32 to vector<8x64xf32>
    %77 = arith.addf %76, %75 : vector<8x64xf32>
    %78 = arith.mulf %70, %77 : vector<8x64xf32>
    %cst_36 = arith.constant -0.284496725 : f32
    %79 = vector.broadcast %cst_36 : f32 to vector<8x64xf32>
    %80 = arith.addf %79, %78 : vector<8x64xf32>
    %81 = arith.mulf %70, %80 : vector<8x64xf32>
    %cst_37 = arith.constant 0.254829586 : f32
    %82 = vector.broadcast %cst_37 : f32 to vector<8x64xf32>
    %83 = arith.addf %82, %81 : vector<8x64xf32>
    %84 = arith.mulf %70, %83 : vector<8x64xf32>
    %cst_38 = arith.constant 0.000000e+00 : f32
    %85 = vector.broadcast %cst_38 : f32 to vector<8x64xf32>
    %86 = arith.subf %85, %65 : vector<8x64xf32>
    %87 = arith.mulf %86, %65 : vector<8x64xf32>
    %88 = math.exp %87 : vector<8x64xf32>
    %89 = arith.mulf %84, %88 : vector<8x64xf32>
    %cst_39 = arith.constant 5.000000e-01 : f32
    %90 = vector.broadcast %cst_39 : f32 to vector<8x64xf32>
    %91 = arith.mulf %90, %62 : vector<8x64xf32>
    %cst_40 = arith.constant 0.000000e+00 : f32
    %92 = vector.broadcast %cst_40 : f32 to vector<8x64xf32>
    %93 = arith.cmpf oge, %62, %92 : vector<8x64xf32>
    %cst_41 = arith.constant 2.000000e+00 : f32
    %94 = vector.broadcast %cst_41 : f32 to vector<8x64xf32>
    %95 = arith.subf %94, %89 : vector<8x64xf32>
    %96 = arith.select %93, %95, %89 : vector<8x64xi1>, vector<8x64xf32>
    %97 = arith.mulf %91, %96 : vector<8x64xf32>
    %98 = arith.truncf %97 : vector<8x64xf32> to vector<8x64xbf16>
    %c0_42 = arith.constant 0 : index
    %c0_43 = arith.constant 0 : index
    %99 = vector.load %arg9[%c0_42, %c0_43] : memref<64x128xbf16, #tpu.memory_space<vmem>>, vector<64x128xbf16>
    %cst_44 = arith.constant dense<0.000000e+00> : vector<8x128xf32>
    %100 = tpu.matmul %98, %99, %cst_44 {dimension_numbers = #tpu.dot_dimension_numbers<[1], [0], [0], [1], [0, 0, 1, 1], [], []>} : vector<8x64xbf16>, vector<64x128xbf16>, vector<8x128xf32> -> vector<8x128xf32>
    %c0_45 = arith.constant 0 : index
    %c0_46 = arith.constant 0 : index
    %101 = vector.load %arg10[%c0_45, %c0_46] : memref<1x128xf32, #tpu.memory_space<vmem>>, vector<1x128xf32>
    %102 = vector.broadcast %101 : vector<1x128xf32> to vector<8x128xf32>
    %103 = arith.addf %100, %102 : vector<8x128xf32>
    %104 = arith.truncf %103 : vector<8x128xf32> to vector<8x128xbf16>
    %c0_47 = arith.constant 0 : index
    %c0_48 = arith.constant 0 : index
    %105 = vector.load %arg11[%c0_47, %c0_48] : memref<8x128xbf16, #tpu.memory_space<vmem>>, vector<8x128xbf16>
    tpu.vector_store %arg11[%c0_47, %c0_48], %104 {strides = array<i32>} : memref<8x128xbf16, #tpu.memory_space<vmem>>, vector<8x128xbf16>,
    return
  }
  func.func @transform_0(%arg0: i32) -> (i32, i32) {
    %c0_i32 = arith.constant 0 : i32
    %c0_i32_0 = arith.constant 0 : i32
    return %arg0, %c0_i32 : i32, i32
  }
  func.func @transform_1(%arg0: i32) -> (i32, i32) {
    %c0_i32 = arith.constant 0 : i32
    %c0_i32_0 = arith.constant 0 : i32
    %c0_i32_1 = arith.constant 0 : i32
    return %c0_i32, %c0_i32_0 : i32, i32
  }
  func.func @transform_2(%arg0: i32) -> (i32, i32) {
    %c0_i32 = arith.constant 0 : i32
    %c0_i32_0 = arith.constant 0 : i32
    %c0_i32_1 = arith.constant 0 : i32
    return %c0_i32, %c0_i32_0 : i32, i32
  }
  func.func @transform_3(%arg0: i32) -> (i32, i32) {
    %c0_i32 = arith.constant 0 : i32
    %c0_i32_0 = arith.constant 0 : i32
    %c0_i32_1 = arith.constant 0 : i32
    return %c0_i32, %c0_i32_0 : i32, i32
  }
  func.func @transform_4(%arg0: i32) -> (i32, i32) {
    %c0_i32 = arith.constant 0 : i32
    %c0_i32_0 = arith.constant 0 : i32
    %c0_i32_1 = arith.constant 0 : i32
    return %c0_i32, %c0_i32_0 : i32, i32
  }
  func.func @transform_5(%arg0: i32) -> (i32, i32) {
    %c0_i32 = arith.constant 0 : i32
    %c0_i32_0 = arith.constant 0 : i32
    %c0_i32_1 = arith.constant 0 : i32
    return %c0_i32, %c0_i32_0 : i32, i32
  }
  func.func @transform_6(%arg0: i32) -> (i32, i32) {
    %c0_i32 = arith.constant 0 : i32
    %c0_i32_0 = arith.constant 0 : i32
    %c0_i32_1 = arith.constant 0 : i32
    return %c0_i32, %c0_i32_0 : i32, i32
  }
  func.func @transform_7(%arg0: i32) -> (i32, i32) {
    %c0_i32 = arith.constant 0 : i32
    %c0_i32_0 = arith.constant 0 : i32
    %c0_i32_1 = arith.constant 0 : i32
    return %c0_i32, %c0_i32_0 : i32, i32
  }
  func.func @transform_8(%arg0: i32) -> (i32, i32) {
    %c0_i32 = arith.constant 0 : i32
    %c0_i32_0 = arith.constant 0 : i32
    %c0_i32_1 = arith.constant 0 : i32
    return %c0_i32, %c0_i32_0 : i32, i32
  }
  func.func @transform_9(%arg0: i32) -> (i32, i32) {
    %c0_i32 = arith.constant 0 : i32
    %c0_i32_0 = arith.constant 0 : i32
    %c0_i32_1 = arith.constant 0 : i32
    return %c0_i32, %c0_i32_0 : i32, i32
  }
  func.func @transform_10(%arg0: i32) -> (i32, i32) {
    %c0_i32 = arith.constant 0 : i32
    %c0_i32_0 = arith.constant 0 : i32
    return %arg0, %c0_i32 : i32, i32
  }
}

</mosaic_0001>

<bundles_post_ra>
// kernel: tpu_custom_call.1
= control target key start
LH: loop header
LB: loop body
LE: loop exit
PB: predicated region body
PF: predicated region fallthrough
CT: control target
= control target key end

     0   :  { %15 = vsyncpa [#allocation3], 0  ;;  %s1260_s0 = inlined_call_operand.hbm [shape: f32[8,32], index: 0, kind: input, shape index: {}]   ;;  %s1261_s1 = inlined_call_operand.vmem [shape: bf16[32,192], index: 1, kind: input, shape index: {}]   ;;  %s1262_s2 = inlined_call_operand.vmem [shape: f32[1,128], index: 2, kind: input, shape index: {}]   ;;  %s1263_s3 = inlined_call_operand.vmem [shape: bf16[128,64], index: 3, kind: input, shape index: {}]   ;;  %s1264_s4 = inlined_call_operand.vmem [shape: f32[1,64], index: 4, kind: input, shape index: {}]   ;;  %s1265_s5 = inlined_call_operand.vmem [shape: bf16[64,64], index: 5, kind: input, shape index: {}]   ;;  %s1266_s6 = inlined_call_operand.vmem [shape: bf16[64,64], index: 6, kind: input, shape index: {}]   ;;  %s1267_s7 = inlined_call_operand.vmem [shape: f32[1,64], index: 7, kind: input, shape index: {}]   ;;  %s1268_s8 = inlined_call_operand.hbm [shape: bf16[64,128], index: 8, kind: input, shape index: {}]   ;;  %s1269_s9 = inlined_call_operand.vmem [shape: f32[1,128], index: 9, kind: input, shape index: {}]   ;;  %s1270_s10 = inlined_call_operand.hbm [shape: bf16[8,128], index: 10, kind: output, shape index: {}]  }
   0x1   :  { %16 = vsyncpa [#allocation6], 0 }
   0x2   :  { %17 = vsyncpa [#allocation4], 0  ;;  %s1020_s13 = smov [#allocation2]   ;;  %s1021_s15 = smov [#allocation5]  }
   0x3   :  { %s24_s14 = sshll.u32 %s1020_s13, 4  ;;  %s47_s16 = sshll.u32 %s1021_s15, 4  ;;  %s25_s14 = int_to_ptr.vmem [resolvable:$true] %s24_s14  ;;  %s1089_s16 = int_to_ptr.vmem [resolvable:$true] %s47_s16 }
   0x4   :  { %s948_s19 = scalar_lea.hbm %s1260_s0, 128 }
   0x5   :  { %p949_p0 = scmp.ne.s32.totalorder %s1260_s0, %s948_s19  ;;  %p952_p1 = scmp.lt.u32.totalorder %s948_s19, %s1260_s0 }
   0x7   :  { %p954_p2 = pnand %p952_p1, %p949_p0 }
   0x9   :  { %957 = shalt.err (!%p954_p2)
}
   0xa   :  { %s958_s24 = scalar_lea.vmem %s25_s14, 128  ;;  %p963_p4 = scmp.lt.s32.totalorder %s25_s14, %s25_s14 }
   0xb   :  { %p959_p3 = scmp.ne.s32.totalorder %s25_s14, %s958_s24  ;;  %p964_p5 = scmp.lt.s32.totalorder %s958_s24, %s958_s24 }
   0xd   :  { %p965_p6 = por %p964_p5, %p963_p4 }
   0xf   :  { %p966_p7 = pnand %p965_p6, %p959_p3 }
  0x11   :  { %969 = shalt.err (!%p966_p7)
}
  0x12   :  { %27 = dma.hbm_to_vmem [thread:$0]  %s1260_s0, 128, %s25_s14, [#allocation3]  }
  0x13   :  { %s970_s29 = scalar_lea.hbm %s1268_s8, 512 }
  0x14   :  { %p971_p8 = scmp.ne.s32.totalorder %s1268_s8, %s970_s29  ;;  %p974_p9 = scmp.lt.u32.totalorder %s970_s29, %s1268_s8 }
  0x16   :  { %p976_p10 = pnand %p974_p9, %p971_p8 }
  0x18   :  { %979 = shalt.err (!%p976_p10)
}
  0x19   :  { %s980_s15 = scalar_lea.vmem %s1089_s16, 512  ;;  %p985_p12 = scmp.lt.s32.totalorder %s1089_s16, %s1089_s16 }
  0x1a   :  { %p981_p11 = scmp.ne.s32.totalorder %s1089_s16, %s980_s15  ;;  %p986_p13 = scmp.lt.s32.totalorder %s980_s15, %s980_s15 }
  0x1c   :  { %p987_p0 = por %p986_p13, %p985_p12 }
  0x1e   :  { %p988_p1 = pnand %p987_p0, %p981_p11 }
  0x20   :  { %991 = shalt.err (!%p988_p1)
}
  0x21   :  { %s1022_s0 = smov 64   ;;  %s1023_s14 = smov 4  }
  0x22   :  { %53 = dma.hbm_to_vmem [thread:$0]  %s1268_s8, 512, %s1089_s16, [#allocation6], %s1022_s0, %s1022_s0, %s1023_s14  }
  0x23   :  { %1014 = dma.done.wait [#allocation3], 128  }
  0x24   :  { %1015 = vsyncadd [#allocation3], 4294967168 }
  0x25   :  { %1016 = dma.done.wait [#allocation6], 512  }
  0x26   :  { %1017 = vsyncadd [#allocation6], 4294966784  ;;  %v1024_v0 = vmov 0   ;;  %v910_v1 = vld [vmem:[%s1261_s1 + $0x4] ss:$8 sps:$4 sm:$0xff]   ;;  %vm89_vm0 = vcmask 261120  }
  0x27   :  { %125 = vmatprep.mubr.bf16.mxu0 %v1024_v0  ;;  %v912_v2 = vld [vmem:[%s1261_s1] ss:$8 sps:$4 sm:$0xff]   ;;  %93 = vmatprep.subr.bf16.mxu0 %v910_v1  ;;  %v913_v3 = vld [vmem:[%s1261_s1 + $0x14] ss:$8 sps:$4 sm:$0xff]   ;;  %v915_v4 = vld [vmem:[%s1261_s1 + $0x10] ss:$8 sps:$4 sm:$0xff]  }
  0x28   :  { %v63_v5 = vld [vmem:[#allocation2] sm:$0xff]  ;;  %94 = vmatpush1.bf16.msra.mxu0 %v912_v2  ;;  %v1025_v8 = vmov 0.0   ;;  %vm1026_vm1 = vmmov 0   ;;  %v917_v9 = vld [vmem:[%s1263_s3 + $0x8] sm:$0xff]   ;;  %v918_v10 = vld [vmem:[%s1263_s3 + $0x10] sm:$0xff]   ;;  %s1033_s0 = smov [#allocation7]  }
  0x29   :  { %95 = vmatprep.subr.bf16.mxu0 %v913_v3  ;;  %v64_v6 = vpack.c.bf16 %v63_v5, %v63_v5  ;;  %v916_v7 = vld [vmem:[%s1263_s3] sm:$0xff]   ;;  %836 = vmatprep.subr.bf16.mxu1 %v1025_v8  ;;  %v919_v11 = vld [vmem:[%s1263_s3 + $0x18] sm:$0xff]   ;;  %v921_v13 = vld [vmem:[%s1263_s3 + $0x28] sm:$0xff]   ;;  %v1027_v3 = vmov 683565275   ;;  %s762_s14 = sshll.u32 %s1033_s0, 4  ;;  %s763_s14 = int_to_ptr.vmem [resolvable:$true] %s762_s14 }
  0x2a   :  { %852 = vmatprep.mubr.msk.bf16.mxu1 %vm1026_vm1, %v1025_v8  ;;  %837 = vmatpush3.bf16.msra.mxu1 %v916_v7  ;;  %v920_v12 = vld [vmem:[%s1263_s3 + $0x20] sm:$0xff]   ;;  %v922_v14 = vld [vmem:[%s1263_s3 + $0x30] sm:$0xff]   ;;  %v923_v15 = vld [vmem:[%s1263_s3 + $0x38] sm:$0xff]   ;;  %v1028_v5 = vmov 2475754826   ;;  %s992_s17 = scalar_lea.vmem %s763_s14, 64  ;;  %p997_p3 = scmp.lt.s32.totalorder %s763_s14, %s763_s14 }
  0x2b   :  { %838 = vmatprep.subr.bf16.mxu1 %v1025_v8  ;;  %v777_v16 = vld [vmem:[%s1262_s2] ss:$0 sm:$0xff]  ;;  %v925_v47 = vld [vmem:[%s1266_s6 + $0x8] sm:$0xff]   ;;  %v926_v48 = vld [vmem:[%s1266_s6 + $0x10] sm:$0xff]   ;;  %p993_p2 = scmp.ne.s32.totalorder %s763_s14, %s992_s17  ;;  %p998_p4 = scmp.lt.s32.totalorder %s992_s17, %s992_s17 }
  0x2c   :  { %96 = vmatpush1.bf16.msra.mxu0 %v915_v4  ;;  %v924_v46 = vld [vmem:[%s1266_s6] sm:$0xff]   ;;  %v927_v49 = vld [vmem:[%s1266_s6 + $0x18] sm:$0xff]  }
  0x2d   :  { %856 = vmatprep.subr.bf16.mxu0 %v1025_v8  ;;  %v778_v50 = vld [vmem:[%s1264_s4] ss:$0 sm:$0xff]  ;;  %p999_p5 = por %p998_p4, %p997_p3 }
  0x2e   :  { %839 = vmatpush3.bf16.msra.mxu1 %v917_v9  ;;  %v1029_v9 = vmov 2131351028  }
  0x2f   :  { %776 = vmatmul.mubr.msk.bf16.vlgmr.msra.gmra.mrb[0].mxu0 %vm89_vm0, %v64_v6  ;;  %840 = vmatprep.subr.bf16.mxu1 %v1025_v8  ;;  %vm528_vm0 = vcmask 523264   ;;  %p1000_p6 = pnand %p999_p5, %p993_p2 }
  0x30   :  { %864 = vmatprep.mubr.msk.bf16.mxu0 %vm1026_vm1, %v1025_v8  ;;  %857 = vmatpush3.bf16.msra.mxu0 %v924_v46 }
  0x31   :  { %858 = vmatprep.subr.bf16.mxu0 %v1025_v8 }
  0x32   :  { %841 = vmatpush3.bf16.msra.mxu1 %v918_v10 }
  0x33   :  { %842 = vmatprep.subr.bf16.mxu1 %v1025_v8 }
  0x34   :  { %859 = vmatpush3.bf16.msra.mxu0 %v925_v47 }
  0x35   :  { %860 = vmatprep.subr.bf16.mxu0 %v1025_v8 }
  0x36   :  { %843 = vmatpush3.bf16.msra.mxu1 %v919_v11 }
  0x37   :  { %844 = vmatprep.subr.bf16.mxu1 %v1025_v8 }
  0x38   :  { %861 = vmatpush3.bf16.msra.mxu0 %v926_v48 }
  0x39   :  { %862 = vmatprep.subr.bf16.mxu0 %v1025_v8 }
  0x3a   :  { %845 = vmatpush3.bf16.msra.mxu1 %v920_v12  ;;  %v1030_v12 = vmov 2102212464  }
  0x3b   :  { %846 = vmatprep.subr.bf16.mxu1 %v1025_v8 }
  0x3c   :  { %863 = vmatpush3.bf16.msra.mxu0 %v927_v49 }
  0x3d   :  { %868 = vmatprep.subr.bf16.mxu0 %v1025_v8 }
  0x3e   :  { %847 = vmatpush3.bf16.msra.mxu1 %v921_v13 }
  0x3f   :  { %848 = vmatprep.subr.bf16.mxu1 %v1025_v8 }
  0x42   :  { %849 = vmatpush3.bf16.msra.mxu1 %v922_v14 }
  0x43   :  { %850 = vmatprep.subr.bf16.mxu1 %v1025_v8 }
  0x46   :  { %851 = vmatpush3.bf16.msra.mxu1 %v923_v15  ;;  %v1031_v15 = vmov 920167782  }
  0x47   :  { %880 = vmatprep.subr.bf16.mxu1 %v1025_v8 }
 0x102   :  { %v127_v17 = vpop.f32.mrb[0].mxu0 }
 0x103   :  { %v141_v18 = vadd.f32 %v777_v16, %v127_v17  ;;  %v129_v19 = vpop.f32.mrb[1].mxu0 }
 0x104   :  { %v131_v20 = vpop.f32.mrb[2].mxu0 }
 0x105   :  { %v142_v21 = vand.u32 2147483647, %v141_v18  ;;  %v132_v22 = vpop.f32.mrb[3].mxu0  ;;  %v161_v42 = vmul.f32 0.5, %v141_v18  ;;  %vm162_vm2 = vcmp.ge.f32.partialorder %v141_v18, 0.0 }
 0x106   :  { %v1032_v18 = vmov 1326507024  }
 0x107   :  { %v143_v23 = vmul.f32 0.70710677, %v142_v21 }
 0x109   :  { %v144_v24 = vmul.f32 0.3275911, %v143_v23  ;;  %v156_v26 = vsub.f32 0.0, %v143_v23 }
 0x10b   :  { %v145_v25 = vadd.f32 1.0, %v144_v24  ;;  %v157_v28 = vmul.f32 %v156_v26, %v143_v23 }
 0x10d   :  { %936 = vrcp.f32 %v145_v25  ;;  %v158_v31 = vmul.f32 1.442695, %v157_v28 }
 0x10f   :  { %938 = vpow2.f32 %v158_v31 }
 0x117   :  { %v937_v27 = vpop.eup %936 }
 0x118   :  { %v147_v29 = vmul.f32 1.0614054, %v937_v27 }
 0x119   :  { %v939_v39 = vpop.eup %938 }
 0x11a   :  { %v148_v30 = vadd.f32 -1.4531521, %v147_v29 }
 0x11c   :  { %v149_v32 = vmul.f32 %v937_v27, %v148_v30 }
 0x11e   :  { %v150_v33 = vadd.f32 1.4214138, %v149_v32 }
 0x120   :  { %v151_v34 = vmul.f32 %v937_v27, %v150_v33 }
 0x122   :  { %v152_v35 = vadd.f32 -0.28449672, %v151_v34 }
 0x124   :  { %v153_v36 = vmul.f32 %v937_v27, %v152_v35 }
 0x126   :  { %v154_v37 = vadd.f32 0.2548296, %v153_v36 }
 0x128   :  { %v155_v38 = vmul.f32 %v937_v27, %v154_v37 }
 0x12a   :  { %v160_v40 = vmul.f32 %v939_v39, %v155_v38 }
 0x12c   :  { %v163_v41 = vsub.f32 2.0, %v160_v40 }
 0x12e   :  { %v164_v43 = vsel %vm162_vm2, %v163_v41, %v160_v40 }
 0x12f   :  { %v165_v44 = vmul.f32 %v164_v43, %v161_v42 }
 0x131   :  { %v166_v45 = vpack.c.bf16 %v165_v44, %v165_v44 }
 0x133   :  { %853 = vmatmul.mubr.bf16.vlgmr.msra.gmra.mrb[0].mxu1 %v166_v45 }
 0x134   :  { %888 = vmatprep.mubr.msk.bf16.mxu1 %vm1026_vm1, %v1025_v8 }
 0x206   :  { %v272_v51 = vpop.f32.mrb[0].mxu1 }
 0x207   :  { %v273_v52 = vadd.f32 %v778_v50, %v272_v51  ;;  %v854_v53 = vpop.f32.mrb[1].mxu1 }
 0x208   :  { %v275_v54 = vpop.f32.mrb[2].mxu1 }
 0x209   :  { %v1194_v55 = vmul.f32 %v273_v52, %v129_v19  ;;  %v855_v56 = vpop.f32.mrb[3].mxu1 }
 0x20b   :  { %v282_v57 = vand.u32 2139095040, %v1194_v55  ;;  %v279_v61 = vand.u32 2147483647, %v1194_v55  ;;  %vm281_vm10 = vcmp.lt.s32.totalorder %v1194_v55, 0  ;;  %vm371_vm15 = vweird.f32 %v1194_v55 }
 0x20d   :  { %v283_v58 = vshrl.u32 %v282_v57, 23  ;;  %v286_v0 = vand.u32 8388607, %v279_v61  ;;  %vm280_vm11 = vcmp.le.f32.partialorder %v279_v61, 0.7853982 }
 0x20f   :  { %v787_v59 = vadd.s32 4294967169, %v283_v58  ;;  %v287_v20 = vor.u32 8388608, %v286_v0 }
 0x211   :  { %v289_v60 = vadd.s32 1, %v787_v59  ;;  %v327_v34 = vshll.u32 %v287_v20, 8 }
 0x213   :  { %vm290_vm3 = vcmp.gt.s32.totalorder %v289_v60, 0 }
 0x214   :  { %v291_v62 = vsel %vm290_vm3, %v289_v60, 0 }
 0x215   :  { %v293_v63 = vand.u32 31, %v291_v62  ;;  %v292_v2 = vshrl.u32 %v291_v62, 5 }
 0x217   :  { %v294_v1 = vsub.s32 32, %v293_v63  ;;  %v296_v4 = vshll.u32 %v1027_v3, %v293_v63  ;;  %v299_v6 = vshll.u32 %v1028_v5, %v293_v63  ;;  %v302_v11 = vshll.u32 %v1029_v9, %v293_v63 }
 0x218   :  { %v305_v14 = vshll.u32 %v1030_v12, %v293_v63  ;;  %v308_v17 = vshll.u32 %v1031_v15, %v293_v63  ;;  %vm311_vm4 = vcmp.lt.s32.totalorder %v292_v2, 1  ;;  %vm314_vm5 = vcmp.lt.s32.totalorder %v292_v2, 4 }
 0x219   :  { %v297_v7 = vshrl.u32 %v1028_v5, %v294_v1  ;;  %v300_v10 = vshrl.u32 %v1029_v9, %v294_v1  ;;  %v303_v13 = vshrl.u32 %v1030_v12, %v294_v1  ;;  %v306_v16 = vshrl.u32 %v1031_v15, %v294_v1 }
 0x21a   :  { %v309_v19 = vshrl.u32 %v1032_v18, %v294_v1  ;;  %v295_v29 = vshrl.u32 %v1027_v3, %v294_v1  ;;  %vm313_vm6 = vcmp.lt.s32.totalorder %v292_v2, 3  ;;  %vm312_vm7 = vcmp.lt.s32.totalorder %v292_v2, 2 }
 0x21b   :  { %v298_v21 = vor.u32 %v297_v7, %v296_v4  ;;  %v301_v22 = vor.u32 %v300_v10, %v299_v6  ;;  %v304_v23 = vor.u32 %v303_v13, %v302_v11  ;;  %v307_v24 = vor.u32 %v306_v16, %v305_v14 }
 0x21c   :  { %v310_v25 = vor.u32 %v309_v19, %v308_v17 }
 0x21d   :  { %v316_v26 = vsel %vm314_vm5, %v304_v23, 2102212464  ;;  %v319_v27 = vsel %vm311_vm4, %v298_v21, %v301_v22  ;;  %v323_v28 = vsel %vm311_vm4, %v301_v22, %v304_v23  ;;  %v320_v30 = vsel %vm314_vm5, %v307_v24, 920167782 }
 0x21e   :  { %v324_v31 = vsel %vm314_vm5, %v310_v25, 1326507024  ;;  %v321_v32 = vsel %vm313_vm6, %v304_v23, %v320_v30  ;;  %v315_v35 = vsel %vm311_vm4, %v295_v29, %v298_v21  ;;  %v317_v36 = vsel %vm313_vm6, %v301_v22, %v316_v26  ;;  %v928_v23 = vld [vmem:[%s1265_s5] sm:$0xff]   ;;  %v929_v26 = vld [vmem:[%s1265_s5 + $0x8] sm:$0xff]  }
 0x21f   :  { %v325_v33 = vsel %vm313_vm6, %v307_v24, %v324_v31  ;;  %v322_v37 = vsel %vm312_vm7, %v319_v27, %v321_v32  ;;  %v318_v43 = vsel %vm312_vm7, %v315_v35, %v317_v36  ;;  %v930_v27 = vld [vmem:[%s1265_s5 + $0x10] sm:$0xff]   ;;  %v931_v31 = vld [vmem:[%s1265_s5 + $0x18] sm:$0xff]  }
 0x220   :  { %v326_v38 = vsel %vm312_vm7, %v323_v28, %v325_v33  ;;  %v1203_v41 = vmul.u32.u64.low %v327_v34, %v322_v37  ;;  %v1204_v42 = vmul.u32.u64.high %v327_v34, %v322_v37, %v1203_v41  ;;  %v334_v45 = vmul.u32 %v327_v34, %v318_v43  ;;  %v933_v35 = vld [vmem:[#allocation5 + $0x8] sm:$0xff]   ;;  %v934_v36 = vld [vmem:[#allocation5 + $0x10] sm:$0xff]   ;;  %v935_v37 = vld [vmem:[#allocation5 + $0x18] sm:$0xff]  }
 0x221   :  { %v1200_v39 = vmul.u32.u64.low %v327_v34, %v326_v38  ;;  %v1201_v40 = vmul.u32.u64.high %v327_v34, %v326_v38, %v1200_v39  ;;  %v932_v34 = vld [vmem:[#allocation5] sm:$0xff]  }
 0x222   :  { %v337_v44 = vadd.s32 1, %v1204_v42  ;;  %881 = vmatpush3.bf16.msra.mxu1 %v932_v34 }
 0x223   :  { %vm336_vm8 = vc.u32 %v1201_v40, %v1203_v41  ;;  %v335_v58 = vadd.s32 %v1203_v41, %v1201_v40  ;;  %882 = vmatprep.subr.bf16.mxu1 %v1025_v8 }
 0x224   :  { %v338_v46 = vsel %vm336_vm8, %v337_v44, %v1204_v42  ;;  %v805_v42 = vld [vmem:[%s1267_s7] ss:$0 sm:$0xff] }
 0x225   :  { %v339_v47 = vadd.s32 %v338_v46, %v334_v45 }
 0x226   :  { %883 = vmatpush3.bf16.msra.mxu1 %v933_v35 }
 0x227   :  { %v340_v48 = vadd.s32 536870912, %v339_v47  ;;  %884 = vmatprep.subr.bf16.mxu1 %v1025_v8 }
 0x229   :  { %v341_v49 = vshrl.u32 %v340_v48, 30 }
 0x22a   :  { %885 = vmatpush3.bf16.msra.mxu1 %v934_v36 }
 0x22b   :  { %v342_v50 = vshll.u32 %v341_v49, 30  ;;  %v365_v7 = vsub.s32 4, %v341_v49  ;;  %886 = vmatprep.subr.bf16.mxu1 %v1025_v8 }
 0x22d   :  { %v343_v51 = vsub.s32 %v339_v47, %v342_v50  ;;  %v366_v11 = vsel %vm281_vm10, %v365_v7, %v341_v49 }
 0x22e   :  { %v368_v13 = vsel %vm280_vm11, 0, %v366_v11  ;;  %887 = vmatpush3.bf16.msra.mxu1 %v935_v37 }
 0x22f   :  { %v345_v52 = vsub.s32 0, %v343_v51  ;;  %v484_v14 = vadd.s32 3, %v368_v13  ;;  %v372_v25 = vand.u32 3, %v368_v13 }
 0x231   :  { %v788_v53 = vmin.u32 %v345_v52, %v343_v51  ;;  %v485_v15 = vand.u32 3, %v484_v14  ;;  %vm374_vm2 = vcmp.eq.s32.totalorder %v372_v25, 0  ;;  %vm377_vm3 = vcmp.eq.s32.totalorder %v372_v25, 2 }
 0x232   :  { %vm373_vm4 = vcmp.lt.s32.totalorder %v372_v25, 2 }
 0x233   :  { %v347_v54 = vclz %v788_v53  ;;  %vm490_vm12 = vcmp.eq.s32.totalorder %v485_v15, 2  ;;  %vm487_vm13 = vcmp.eq.s32.totalorder %v485_v15, 0  ;;  %vm486_vm14 = vcmp.lt.s32.totalorder %v485_v15, 2 }
 0x235   :  { %v789_v56 = vadd.s32 4294967294, %v347_v54 }
 0x237   :  { %vm790_vm9 = vcmp.lt.s32.totalorder %v789_v56, 0 }
 0x238   :  { %v350_v57 = vsel %vm790_vm9, 0, %v789_v56 }
 0x239   :  { %v351_v59 = vsub.s32 32, %v350_v57  ;;  %v355_v60 = vsub.s32 4294967266, %v350_v57  ;;  %v352_v62 = vshll.u32 %v343_v51, %v350_v57 }
 0x23b   :  { %v353_v63 = vshrl.u32 %v335_v58, %v351_v59  ;;  %v356_v0 = vadd.s32 127, %v355_v60 }
 0x23d   :  { %v354_v1 = vor.u32 %v353_v63, %v352_v62  ;;  %v357_v2 = vshll.u32 %v356_v0, 23 }
 0x23f   :  { %v358_v3 = vor.u32 4788187, %v357_v2  ;;  %v361_v5 = vcvt.s32.f32 %v354_v1 }
 0x241   :  { %v359_v4 = vand.u32 2147483647, %v358_v3 }
 0x243   :  { %v362_v6 = vmul.f32 %v361_v5, %v359_v4 }
 0x245   :  { %v363_v9 = vxor.u32 2147483648, %v362_v6 }
 0x247   :  { %v364_v10 = vsel %vm281_vm10, %v363_v9, %v362_v6 }
 0x248   :  { %v367_v12 = vsel %vm280_vm11, %v1194_v55, %v364_v10  ;;  %v806_v10 = vld [vmem:[%s1269_s9] ss:$0 sm:$0xff] }
 0x249   :  { %940 = vcosq.f32 %v367_v12 }
 0x24a   :  { %942 = vsinq.f32 %v367_v12 }
 0x253   :  { %v941_v16 = vpop.eup %940 }
 0x254   :  { %v943_v17 = vpop.eup %942  ;;  %v378_v18 = vxor.u32 2147483648, %v941_v16 }
 0x255   :  { %v375_v19 = vxor.u32 2147483648, %v943_v17 }
 0x256   :  { %v492_v20 = vsel %vm490_vm12, %v378_v18, %v943_v17  ;;  %v379_v29 = vsel %vm377_vm3, %v378_v18, %v943_v17 }
 0x257   :  { %v489_v21 = vsel %vm487_vm13, %v941_v16, %v375_v19  ;;  %v376_v28 = vsel %vm374_vm2, %v941_v16, %v375_v19 }
 0x258   :  { %v493_v61 = vsel %vm486_vm14, %v489_v21, %v492_v20  ;;  %v380_v30 = vsel %vm373_vm4, %v376_v28, %v379_v29 }
 0x259   :  { %v494_v22 = vsel %vm371_vm15, nan, %v493_v61  ;;  %v381_v32 = vsel %vm371_vm15, nan, %v380_v30 }
 0x25a   :  { %v495_v24 = vpack.c.bf16 %v494_v22, %v494_v22  ;;  %v382_v33 = vpack.c.bf16 %v381_v32, %v381_v32 }
 0x25c   :  { %865 = vmatmul.mubr.msk.bf16.vlgmr.msra.gmra.mrb[4].mxu0 %vm528_vm0, %v495_v24 }
 0x25d   :  { %869 = vmatpush3.bf16.msra.mxu0 %v928_v23  ;;  %876 = vmatprep.mubr.msk.bf16.mxu0 %vm1026_vm1, %v1025_v8 }
 0x25e   :  { %870 = vmatprep.subr.bf16.mxu0 %v1025_v8 }
 0x261   :  { %871 = vmatpush3.bf16.msra.mxu0 %v929_v26 }
 0x262   :  { %872 = vmatprep.subr.bf16.mxu0 %v1025_v8 }
 0x265   :  { %873 = vmatpush3.bf16.msra.mxu0 %v930_v27 }
 0x266   :  { %874 = vmatprep.subr.bf16.mxu0 %v1025_v8 }
 0x269   :  { %875 = vmatpush3.bf16.msra.mxu0 %v931_v31 }
 0x26c   :  { %877 = vmatmul.mubr.msk.bf16.vlgmr.msra.gmra.mrb[8].mxu0 %vm528_vm0, %v382_v33 }
 0x32f   :  { %v566_v55 = vpop.f32.mrb[4].mxu0 }
 0x330   :  { %v866_v38 = vpop.f32.mrb[5].mxu0 }
 0x331   :  { %v569_v39 = vpop.f32.mrb[6].mxu0 }
 0x332   :  { %v867_v40 = vpop.f32.mrb[7].mxu0 }
 0x33f   :  { %v633_v41 = vpop.f32.mrb[8].mxu0 }
 0x340   :  { %v634_v43 = vadd.f32 %v633_v41, %v566_v55  ;;  %v878_v44 = vpop.f32.mrb[9].mxu0 }
 0x341   :  { %v636_v45 = vpop.f32.mrb[10].mxu0 }
 0x342   :  { %v646_v46 = vadd.f32 %v805_v42, %v634_v43  ;;  %v879_v47 = vpop.f32.mrb[11].mxu0 }
 0x344   :  { %v647_v48 = vand.u32 2147483647, %v646_v46  ;;  %v666_v5 = vmul.f32 0.5, %v646_v46  ;;  %vm667_vm1 = vcmp.ge.f32.partialorder %v646_v46, 0.0 }
 0x346   :  { %v648_v49 = vmul.f32 0.70710677, %v647_v48 }
 0x348   :  { %v649_v50 = vmul.f32 0.3275911, %v648_v49  ;;  %v661_v51 = vsub.f32 0.0, %v648_v49 }
 0x34a   :  { %v650_v8 = vadd.f32 1.0, %v649_v50  ;;  %v662_v53 = vmul.f32 %v661_v51, %v648_v49 }
 0x34c   :  { %944 = vrcp.f32 %v650_v8  ;;  %v663_v57 = vmul.f32 1.442695, %v662_v53 }
 0x34e   :  { %946 = vpow2.f32 %v663_v57 }
 0x356   :  { %v945_v52 = vpop.eup %944 }
 0x357   :  { %v652_v54 = vmul.f32 1.0614054, %v945_v52 }
 0x358   :  { %v947_v2 = vpop.eup %946 }
 0x359   :  { %v653_v56 = vadd.f32 -1.4531521, %v652_v54 }
 0x35b   :  { %v654_v58 = vmul.f32 %v945_v52, %v653_v56 }
 0x35d   :  { %v655_v59 = vadd.f32 1.4214138, %v654_v58 }
 0x35f   :  { %v656_v60 = vmul.f32 %v945_v52, %v655_v59 }
 0x361   :  { %v657_v62 = vadd.f32 -0.28449672, %v656_v60 }
 0x363   :  { %v658_v63 = vmul.f32 %v945_v52, %v657_v62 }
 0x365   :  { %v659_v0 = vadd.f32 0.2548296, %v658_v63 }
 0x367   :  { %v660_v1 = vmul.f32 %v945_v52, %v659_v0 }
 0x369   :  { %v665_v3 = vmul.f32 %v947_v2, %v660_v1 }
 0x36b   :  { %v668_v4 = vsub.f32 2.0, %v665_v3 }
 0x36d   :  { %v669_v6 = vsel %vm667_vm1, %v668_v4, %v665_v3 }
 0x36e   :  { %v670_v7 = vmul.f32 %v669_v6, %v666_v5 }
 0x370   :  { %v671_v9 = vpack.c.bf16 %v670_v7, %v670_v7 }
 0x372   :  { %889 = vmatmul.mubr.msk.bf16.vlgmr.msra.gmra.mrb[4].mxu1 %vm528_vm0, %v671_v9 }
 0x445   :  { %v748_v11 = vpop.f32.mrb[4].mxu1 }
 0x446   :  { %v749_v12 = vadd.f32 %v806_v10, %v748_v11  ;;  %v890_v13 = vpop.f32.mrb[5].mxu1 }
 0x447   :  { %v751_v14 = vpop.f32.mrb[6].mxu1 }
 0x448   :  { %v754_v15 = vpack.c.bf16 %v749_v12, %v749_v12  ;;  %v891_v16 = vpop.f32.mrb[7].mxu1 }
 0x44a   :  { %755 = vst [vmem:[#allocation7] sm:$0xf] %v754_v15 }
 0x44b   :  { %1003 = shalt.err (!%p1000_p6)
}
 0x44c   :  { %s1004_s9 = scalar_lea.hbm %s1270_s10, 64 }
 0x44d   :  { %p1005_p7 = scmp.ne.s32.totalorder %s1270_s10, %s1004_s9  ;;  %p1008_p8 = scmp.lt.u32.totalorder %s1004_s9, %s1270_s10 }
 0x44f   :  { %p1010_p9 = pnand %p1008_p8, %p1005_p7 }
 0x451   :  { %1013 = shalt.err (!%p1010_p9)
}
 0x452   :  { %765 = dma.vmem_to_hbm [thread:$0]  %s763_s14, 64, %s1270_s10, [#allocation4]  }
 0x453   :  { %1018 = dma.done.wait [#allocation4], 64  }
 0x454   :  { %1019 = vsyncadd [#allocation4], 4294967232 }
 0x455   :  { %769 = vsyncpa [#allocation3], 1 }
 0x456   :  { %770 = vsyncpa [#allocation6], 1 }
 0x457   :  { %771 = vsyncpa [#allocation4], 1 }

</bundles_post_ra>
